<compile_context>
chip_gen: v6e
topology: v6e:2x2x1
jax: 0.10.0
libtpu: 0.0.40
codegen_flags: <defaults>
</compile_context>

<pallas_src>
import functools

import jax
import jax.numpy as jnp
from jax.experimental import pallas as pl
from jax.experimental.pallas import tpu as pltpu

# Logical hidden sizes (PyTorch module) and their lane-aligned padded sizes.
H1, H2 = 400, 300
H1P, H2P = 512, 384          # multiples of 128 -> full, unmasked MXU tiles
TB_MAX = 1024                # batch tile (multiple of 16); activations stay << VMEM


def _round_up(n, m):
    return -(-n // m) * m


def actor_mlp_kernel(x_ref, w1_ref, b1_ref, w2_ref, b2_ref, w3_ref, b3_ref, o_ref):
    act_size = o_ref.shape[-1]
    # Cast x to bf16 in-kernel (rides the VPU slot under MXU work).
    x = x_ref[...].astype(jnp.bfloat16)
    # Layer 1: Linear(obs -> 512 padded) + ReLU.  bf16 MXU inputs, f32 accumulate.
    h1 = jnp.dot(x, w1_ref[...], preferred_element_type=jnp.float32)
    h1 = jnp.maximum(h1 + b1_ref[...], 0.0)
    # Layer 2: Linear(512 -> 384 padded) + ReLU.
    h2 = jnp.dot(h1.astype(jnp.bfloat16), w2_ref[...],
                 preferred_element_type=jnp.float32)
    h2 = jnp.maximum(h2 + b2_ref[...], 0.0)
    # Layer 3: Linear(384 -> 128 padded MXU tile) + Tanh, stored narrow (act_size).
    h3 = jnp.dot(h2.astype(jnp.bfloat16), w3_ref[...],
                 preferred_element_type=jnp.float32)
    o_ref[...] = jnp.tanh(h3[:, :act_size] + b3_ref[...]).astype(o_ref.dtype)


def pack_params(params):
    """Pad params to lane-aligned shapes and cast weights to bf16 (done once).

    b3 stays unpadded (1, act_size) since the output / epilogue are narrow."""
    def pad_to(a, shape):
        return jnp.pad(a, [(0, t - s) for s, t in zip(a.shape, shape)])

    obs_size = params["w1"].shape[0]
    act_size = params["w3"].shape[1]
    act_p = _round_up(act_size, 128)
    return {
        "w1": pad_to(params["w1"], (obs_size, H1P)).astype(jnp.bfloat16),
        "b1": pad_to(params["b1"], (1, H1P)).astype(jnp.float32),
        "w2": pad_to(params["w2"], (H1P, H2P)).astype(jnp.bfloat16),
        "b2": pad_to(params["b2"], (1, H2P)).astype(jnp.float32),
        "w3": pad_to(params["w3"], (H2P, act_p)).astype(jnp.bfloat16),
        "b3": params["b3"].astype(jnp.float32),          # (1, act_size), unpadded
    }


@jax.jit
def actor_d4pg_forward(x, packed):
    """x: (batch, obs_size) f32.  packed: output of pack_params.
    Returns (batch, act_size) f32."""
    batch, obs_size = x.shape
    act_p = packed["w3"].shape[1]
    act_size = packed["b3"].shape[1]

    # Batch tile: multiple of 16 (bf16-friendly sublane packing after the in-kernel
    # cast), capped at TB_MAX.  For large batches keep >=4 grid steps so the
    # "parallel" batch axis can shard across v7x's 2 TensorCores and the pipeline
    # has depth; for small batches a single tile avoids pure per-step overhead.
    if batch <= 512:
        tb = _round_up(batch, 16)
    else:
        tb = min(TB_MAX, _round_up(pl.cdiv(batch, 4), 128))
    padded_batch = _round_up(batch, tb)
    xp = jnp.pad(x, ((0, padded_batch - batch), (0, 0)))   # stays f32
    grid = (padded_batch // tb,)

    param_bytes = sum(int(v.size) * v.dtype.itemsize for v in packed.values())
    cost = pl.CostEstimate(
        # Padded matmul sizes = actual MXU work executed.
        flops=2 * padded_batch * (obs_size * H1P + H1P * H2P + H2P * act_p),
        transcendentals=padded_batch * act_size,
        bytes_accessed=int(xp.size) * 4 + param_bytes + padded_batch * act_size * 4,
    )

    out = pl.pallas_call(
        actor_mlp_kernel,
        out_shape=jax.ShapeDtypeStruct((padded_batch, act_size), jnp.float32),
        grid=grid,
        in_specs=[
            # Activations: tiled along batch (pipelined across grid steps).
            pl.BlockSpec((tb, obs_size), lambda i: (i, 0)),
            # Weights / biases: constant block index -> resident in VMEM across steps.
            pl.BlockSpec((obs_size, H1P), lambda i: (0, 0)),
            pl.BlockSpec((1, H1P), lambda i: (0, 0)),
            pl.BlockSpec((H1P, H2P), lambda i: (0, 0)),
            pl.BlockSpec((1, H2P), lambda i: (0, 0)),
            pl.BlockSpec((H2P, act_p), lambda i: (0, 0)),
            pl.BlockSpec((1, act_size), lambda i: (0, 0)),
        ],
        # Narrow output: last dim equals the full array dim, so <128 lanes is legal.
        out_specs=pl.BlockSpec((tb, act_size), lambda i: (i, 0)),
        compiler_params=pltpu.CompilerParams(
            dimension_semantics=("parallel",),
        ),
        cost_estimate=cost,
    )(xp, packed["w1"], packed["b1"], packed["w2"], packed["b2"],
      packed["w3"], packed["b3"])

    return out[:batch]


def init_params(key, obs_size, act_size):
    """PyTorch nn.Linear default init: U(-1/sqrt(fan_in), +1/sqrt(fan_in)).
    Weights stored transposed vs. PyTorch, i.e. (in, out); bias as (1, out)."""
    dims = [(obs_size, H1), (H1, H2), (H2, act_size)]
    params = {}
    for idx, (fan_in, fan_out) in enumerate(dims, start=1):
        key, kw, kb = jax.random.split(key, 3)
        bound = 1.0 / jnp.sqrt(jnp.float32(fan_in))
        params[f"w{idx}"] = jax.random.uniform(
            kw, (fan_in, fan_out), jnp.float32, minval=-bound, maxval=bound)
        params[f"b{idx}"] = jax.random.uniform(
            kb, (1, fan_out), jnp.float32, minval=-bound, maxval=bound)
    return params


def reference_forward(x, p):
    h1 = jnp.maximum(x @ p["w1"] + p["b1"], 0.0)
    h2 = jnp.maximum(h1 @ p["w2"] + p["b2"], 0.0)
    return jnp.tanh(h2 @ p["w3"] + p["b3"])


if __name__ == "__main__":
    obs_size, act_size, batch = 16, 8, 2
    key = jax.random.PRNGKey(0)
    key, kx = jax.random.split(key)
    x = jax.random.normal(kx, (batch, obs_size), jnp.float32)
    params = init_params(key, obs_size, act_size)
    packed = pack_params(params)

    out = actor_d4pg_forward(x, packed)
    out = jax.block_until_ready(out)

    ref = reference_forward(x, params)  # full-f32 reference
    assert out.shape == (batch, act_size)
    # bf16 matmul inputs with f32 accumulation -> loosened tolerance vs f32 ref.
    assert jnp.allclose(out, ref, atol=5e-2, rtol=5e-2)
    print("KERNEL_OK")
</pallas_src>

<mosaic_0001>
module attributes {stable_mosaic.version = 11 : i64} {
  func.func @actor_mlp_kernel(%arg0: i32, %arg1: memref<16x16xf32, #tpu.memory_space<vmem>>, %arg2: memref<16x512xbf16, #tpu.memory_space<vmem>>, %arg3: memref<1x512xf32, #tpu.memory_space<vmem>>, %arg4: memref<512x384xbf16, #tpu.memory_space<vmem>>, %arg5: memref<1x384xf32, #tpu.memory_space<vmem>>, %arg6: memref<384x128xbf16, #tpu.memory_space<vmem>>, %arg7: memref<1x8xf32, #tpu.memory_space<vmem>>, %arg8: memref<16x8xf32, #tpu.memory_space<vmem>>) attributes {dimension_semantics = [#tpu.dimension_semantics<parallel>], iteration_bounds = array<i64: 1>, scalar_prefetch = 0 : i64, scratch_operands = 0 : i64, tpu.core_type = #tpu.core_type<tc>, window_params = [{transform_indices = @transform_0, window_bounds = array<i64: 16, 16>}, {pipeline_mode = #tpu.pipeline_mode<synchronous>, transform_indices = @transform_1, window_bounds = array<i64: 16, 512>}, {pipeline_mode = #tpu.pipeline_mode<synchronous>, transform_indices = @transform_2, window_bounds = array<i64: 1, 512>}, {pipeline_mode = #tpu.pipeline_mode<synchronous>, transform_indices = @transform_3, window_bounds = array<i64: 512, 384>}, {pipeline_mode = #tpu.pipeline_mode<synchronous>, transform_indices = @transform_4, window_bounds = array<i64: 1, 384>}, {pipeline_mode = #tpu.pipeline_mode<synchronous>, transform_indices = @transform_5, window_bounds = array<i64: 384, 128>}, {pipeline_mode = #tpu.pipeline_mode<synchronous>, transform_indices = @transform_6, window_bounds = array<i64: 1, 8>}, {transform_indices = @transform_7, window_bounds = array<i64: 16, 8>}]} {
    %c0 = arith.constant 0 : index
    %c0_0 = arith.constant 0 : index
    %0 = vector.load %arg1[%c0, %c0_0] : memref<16x16xf32, #tpu.memory_space<vmem>>, vector<16x16xf32>
    %1 = arith.truncf %0 : vector<16x16xf32> to vector<16x16xbf16>
    %c0_1 = arith.constant 0 : index
    %c0_2 = arith.constant 0 : index
    %2 = vector.load %arg2[%c0_1, %c0_2] : memref<16x512xbf16, #tpu.memory_space<vmem>>, vector<16x512xbf16>
    %cst = arith.constant dense<0.000000e+00> : vector<16x512xf32>
    %3 = tpu.matmul %1, %2, %cst {dimension_numbers = #tpu.dot_dimension_numbers<[1], [0], [0], [1], [0, 0, 1, 1], [], []>} : vector<16x16xbf16>, vector<16x512xbf16>, vector<16x512xf32> -> vector<16x512xf32>
    %c0_3 = arith.constant 0 : index
    %c0_4 = arith.constant 0 : index
    %4 = vector.load %arg3[%c0_3, %c0_4] : memref<1x512xf32, #tpu.memory_space<vmem>>, vector<1x512xf32>
    %5 = vector.broadcast %4 : vector<1x512xf32> to vector<16x512xf32>
    %6 = arith.addf %3, %5 : vector<16x512xf32>
    %cst_5 = arith.constant 0.000000e+00 : f32
    %7 = vector.broadcast %cst_5 : f32 to vector<16x512xf32>
    %8 = arith.maximumf %6, %7 : vector<16x512xf32>
    %9 = arith.truncf %8 : vector<16x512xf32> to vector<16x512xbf16>
    %c0_6 = arith.constant 0 : index
    %c0_7 = arith.constant 0 : index
    %10 = vector.load %arg4[%c0_6, %c0_7] : memref<512x384xbf16, #tpu.memory_space<vmem>>, vector<512x384xbf16>
    %cst_8 = arith.constant dense<0.000000e+00> : vector<16x384xf32>
    %11 = tpu.matmul %9, %10, %cst_8 {dimension_numbers = #tpu.dot_dimension_numbers<[1], [0], [0], [1], [0, 0, 1, 1], [], []>} : vector<16x512xbf16>, vector<512x384xbf16>, vector<16x384xf32> -> vector<16x384xf32>
    %c0_9 = arith.constant 0 : index
    %c0_10 = arith.constant 0 : index
    %12 = vector.load %arg5[%c0_9, %c0_10] : memref<1x384xf32, #tpu.memory_space<vmem>>, vector<1x384xf32>
    %13 = vector.broadcast %12 : vector<1x384xf32> to vector<16x384xf32>
    %14 = arith.addf %11, %13 : vector<16x384xf32>
    %cst_11 = arith.constant 0.000000e+00 : f32
    %15 = vector.broadcast %cst_11 : f32 to vector<16x384xf32>
    %16 = arith.maximumf %14, %15 : vector<16x384xf32>
    %17 = arith.truncf %16 : vector<16x384xf32> to vector<16x384xbf16>
    %c0_12 = arith.constant 0 : index
    %c0_13 = arith.constant 0 : index
    %18 = vector.load %arg6[%c0_12, %c0_13] : memref<384x128xbf16, #tpu.memory_space<vmem>>, vector<384x128xbf16>
    %cst_14 = arith.constant dense<0.000000e+00> : vector<16x128xf32>
    %19 = tpu.matmul %17, %18, %cst_14 {dimension_numbers = #tpu.dot_dimension_numbers<[1], [0], [0], [1], [0, 0, 1, 1], [], []>} : vector<16x384xbf16>, vector<384x128xbf16>, vector<16x128xf32> -> vector<16x128xf32>
    %20 = vector.extract_strided_slice %19 {offsets = [0, 0], sizes = [16, 8], strides = [1, 1]} : vector<16x128xf32> to vector<16x8xf32>
    %c0_15 = arith.constant 0 : index
    %c0_16 = arith.constant 0 : index
    %21 = vector.load %arg7[%c0_15, %c0_16] : memref<1x8xf32, #tpu.memory_space<vmem>>, vector<1x8xf32>
    %22 = vector.broadcast %21 : vector<1x8xf32> to vector<16x8xf32>
    %23 = arith.addf %20, %22 : vector<16x8xf32>
    %24 = math.tanh %23 : vector<16x8xf32>
    %c0_17 = arith.constant 0 : index
    %c0_18 = arith.constant 0 : index
    %25 = vector.load %arg8[%c0_17, %c0_18] : memref<16x8xf32, #tpu.memory_space<vmem>>, vector<16x8xf32>
    tpu.vector_store %arg8[%c0_17, %c0_18], %24 {strides = array<i32>} : memref<16x8xf32, #tpu.memory_space<vmem>>, vector<16x8xf32>,
    return
  }
  func.func @transform_0(%arg0: i32) -> (i32, i32) {
    %c0_i32 = arith.constant 0 : i32
    %c0_i32_0 = arith.constant 0 : i32
    return %arg0, %c0_i32 : i32, i32
  }
  func.func @transform_1(%arg0: i32) -> (i32, i32) {
    %c0_i32 = arith.constant 0 : i32
    %c0_i32_0 = arith.constant 0 : i32
    %c0_i32_1 = arith.constant 0 : i32
    return %c0_i32, %c0_i32_0 : i32, i32
  }
  func.func @transform_2(%arg0: i32) -> (i32, i32) {
    %c0_i32 = arith.constant 0 : i32
    %c0_i32_0 = arith.constant 0 : i32
    %c0_i32_1 = arith.constant 0 : i32
    return %c0_i32, %c0_i32_0 : i32, i32
  }
  func.func @transform_3(%arg0: i32) -> (i32, i32) {
    %c0_i32 = arith.constant 0 : i32
    %c0_i32_0 = arith.constant 0 : i32
    %c0_i32_1 = arith.constant 0 : i32
    return %c0_i32, %c0_i32_0 : i32, i32
  }
  func.func @transform_4(%arg0: i32) -> (i32, i32) {
    %c0_i32 = arith.constant 0 : i32
    %c0_i32_0 = arith.constant 0 : i32
    %c0_i32_1 = arith.constant 0 : i32
    return %c0_i32, %c0_i32_0 : i32, i32
  }
  func.func @transform_5(%arg0: i32) -> (i32, i32) {
    %c0_i32 = arith.constant 0 : i32
    %c0_i32_0 = arith.constant 0 : i32
    %c0_i32_1 = arith.constant 0 : i32
    return %c0_i32, %c0_i32_0 : i32, i32
  }
  func.func @transform_6(%arg0: i32) -> (i32, i32) {
    %c0_i32 = arith.constant 0 : i32
    %c0_i32_0 = arith.constant 0 : i32
    %c0_i32_1 = arith.constant 0 : i32
    return %c0_i32, %c0_i32_0 : i32, i32
  }
  func.func @transform_7(%arg0: i32) -> (i32, i32) {
    %c0_i32 = arith.constant 0 : i32
    %c0_i32_0 = arith.constant 0 : i32
    return %arg0, %c0_i32 : i32, i32
  }
}

</mosaic_0001>

<bundles_post_ra>
// kernel: actor_d4pg_forward.1
= control target key start
LH: loop header
LB: loop body
LE: loop exit
PB: predicated region body
PF: predicated region fallthrough
CT: control target
= control target key end

     0   :  { %12 = vsyncpa [#allocation3], 0  ;;  %s1915_s0 = inlined_call_operand.vmem [shape: f32[16,16], index: 0, kind: input, shape index: {}]   ;;  %s1916_s1 = inlined_call_operand.hbm [shape: bf16[16,512], index: 1, kind: input, shape index: {}]   ;;  %s1917_s2 = inlined_call_operand.vmem [shape: f32[1,512], index: 2, kind: input, shape index: {}]   ;;  %s1918_s3 = inlined_call_operand.hbm [shape: bf16[512,384], index: 3, kind: input, shape index: {}]   ;;  %s1919_s4 = inlined_call_operand.vmem [shape: f32[1,384], index: 4, kind: input, shape index: {}]   ;;  %s1920_s5 = inlined_call_operand.hbm [shape: bf16[384,128], index: 5, kind: input, shape index: {}]   ;;  %s1921_s6 = inlined_call_operand.vmem [shape: f32[1,8], index: 6, kind: input, shape index: {}]   ;;  %s1922_s7 = inlined_call_operand.vmem [shape: f32[16,8], index: 7, kind: output, shape index: {}]  }
   0x1   :  { %13 = vsyncpa [#allocation5], 0  ;;  %s1807_s24 = smov [#allocation4]  }
   0x2   :  { %s35_s25 = sshll.u32 %s1807_s24, 4  ;;  %s36_s25 = int_to_ptr.vmem [resolvable:$true] %s35_s25 }
   0x3   :  { %s1751_s26 = scalar_lea.vmem %s36_s25, 12288  ;;  %p1756_p1 = scmp.lt.s32.totalorder %s36_s25, %s36_s25 }
   0x4   :  { %p1752_p0 = scmp.ne.s32.totalorder %s36_s25, %s1751_s26  ;;  %p1757_p2 = scmp.lt.s32.totalorder %s1751_s26, %s1751_s26 }
   0x6   :  { %p1758_p3 = por %p1757_p2, %p1756_p1 }
   0x8   :  { %p1759_p4 = pnand %p1758_p3, %p1752_p0 }
   0xa   :  { %1762 = shalt.err (!%p1759_p4)
}
   0xb   :  { %s1808_s27 = smov 192   ;;  %s1809_s28 = smov 12  }
   0xc   :  { %41 = dma.hbm_to_vmem [thread:$0]  %s1918_s3, 12288, %s36_s25, [#allocation5], %s1808_s27, %s1808_s27, %s1809_s28  }
   0xd   :  { %s1810_s8 = smov [#allocation2]  }
   0xe   :  { %s21_s9 = sshll.u32 %s1810_s8, 4  ;;  %s22_s9 = int_to_ptr.vmem [resolvable:$true] %s21_s9 }
   0xf   :  { %s1771_s10 = scalar_lea.vmem %s22_s9, 512  ;;  %p1776_p6 = scmp.lt.s32.totalorder %s22_s9, %s22_s9 }
  0x10   :  { %p1772_p5 = scmp.ne.s32.totalorder %s22_s9, %s1771_s10  ;;  %p1777_p7 = scmp.lt.s32.totalorder %s1771_s10, %s1771_s10 }
  0x12   :  { %p1778_p8 = por %p1777_p7, %p1776_p6 }
  0x14   :  { %p1779_p9 = pnand %p1778_p8, %p1772_p5 }
  0x16   :  { %1782 = shalt.err (!%p1779_p9)
}
  0x17   :  { %s1811_s11 = smov 256   ;;  %s1812_s12 = smov 16  }
  0x18   :  { %27 = dma.hbm_to_vmem [thread:$0]  %s1916_s1, 512, %s22_s9, [#allocation3], %s1811_s11, %s1811_s11, %s1812_s12  }
  0x19   :  { %s1813_s15 = smov [#allocation6]  }
  0x1a   :  { %s49_s16 = sshll.u32 %s1813_s15, 4  ;;  %s50_s16 = int_to_ptr.vmem [resolvable:$true] %s49_s16 }
  0x1b   :  { %s1791_s3 = scalar_lea.vmem %s50_s16, 3072  ;;  %p1796_p11 = scmp.lt.s32.totalorder %s50_s16, %s50_s16 }
  0x1c   :  { %p1792_p10 = scmp.ne.s32.totalorder %s50_s16, %s1791_s3  ;;  %p1797_p12 = scmp.lt.s32.totalorder %s1791_s3, %s1791_s3 }
  0x1e   :  { %p1798_p13 = por %p1797_p12, %p1796_p11 }
  0x20   :  { %p1799_p0 = pnand %p1798_p13, %p1792_p10 }
  0x22   :  { %1802 = shalt.err (!%p1799_p0)
}
  0x23   :  { %s1814_s17 = smov 64   ;;  %s1815_s18 = smov 4  }
  0x24   :  { %55 = dma.hbm_to_vmem [thread:$0]  %s1920_s5, 3072, %s50_s16, [#allocation5], %s1814_s17, %s1814_s17, %s1815_s18  }
  0x25   :  { %1803 = dma.done.wait [#allocation3], 512  }
  0x26   :  { %1804 = vsyncadd [#allocation3], 4294966784 }
  0x27   :  { %1805 = dma.done.wait [#allocation5], 15360  }
  0x28   :  { %1806 = vsyncadd [#allocation5], 4294951936  ;;  %v1816_v0 = vmov 0   ;;  %v1581_v1 = vld [vmem:[#allocation2 + $0x4] ss:$16 sps:$4 sm:$0xff]   ;;  %v69_v6 = vld [vmem:[%s1915_s0 + $0x8] sm:$0xff] }
  0x29   :  { %153 = vmatprep.mubr.bf16.mxu0 %v1816_v0  ;;  %196 = vmatprep.mubr.bf16.mxu1 %v1816_v0  ;;  %v1583_v2 = vld [vmem:[#allocation2 + $0xc] ss:$16 sps:$4 sm:$0xff]   ;;  %v1585_v3 = vld [vmem:[#allocation2] ss:$16 sps:$4 sm:$0xff]   ;;  %v1586_v4 = vld [vmem:[#allocation2 + $0x8] ss:$16 sps:$4 sm:$0xff]  }
  0x2a   :  { %135 = vmatprep.subr.bf16.mxu0 %v1581_v1  ;;  %v68_v5 = vld [vmem:[%s1915_s0] sm:$0xff]  ;;  %178 = vmatprep.subr.bf16.mxu1 %v1583_v2  ;;  %vm117_vm0 = vcmask 130048   ;;  %v1587_v8 = vld [vmem:[#allocation4 + $0xa8] ss:$12 sps:$4 sm:$0xff]   ;;  %v1589_v9 = vld [vmem:[#allocation4 + $0xac] ss:$12 sps:$4 sm:$0xff]  }
  0x2b   :  { %136 = vmatpush1.bf16.msra.mxu0 %v1585_v3  ;;  %179 = vmatpush1.bf16.msra.mxu1 %v1586_v4  ;;  %v70_v7 = vpack.c.bf16 %v69_v6, %v68_v5  ;;  %v1590_v10 = vld [vmem:[#allocation4 + $0x228] ss:$12 sps:$4 sm:$0xff]   ;;  %v1592_v11 = vld [vmem:[#allocation4 + $0x22c] ss:$12 sps:$4 sm:$0xff]   ;;  %v1593_v13 = vld [vmem:[#allocation4 + $0x90] ss:$12 sps:$4 sm:$0xff]  }
  0x2c   :  { %876 = vmatprep.subr.bf16.mxu0 %v1589_v9  ;;  %v1595_v12 = vld [vmem:[#allocation4 + $0x94] ss:$12 sps:$4 sm:$0xff]   ;;  %919 = vmatprep.subr.bf16.mxu1 %v1592_v11  ;;  %v1596_v15 = vld [vmem:[#allocation4 + $0x210] ss:$12 sps:$4 sm:$0xff]   ;;  %v1599_v18 = vld [vmem:[#allocation4 + $0x78] ss:$12 sps:$4 sm:$0xff]  }
  0x2d   :  { %v1598_v14 = vld [vmem:[#allocation4 + $0x214] ss:$12 sps:$4 sm:$0xff]   ;;  %v1601_v16 = vld [vmem:[#allocation4 + $0x7c] ss:$12 sps:$4 sm:$0xff]   ;;  %v1602_v19 = vld [vmem:[#allocation4 + $0x1f8] ss:$12 sps:$4 sm:$0xff]  }
  0x2e   :  { %1351 = vmatmul.mubr.msk.bf16.vlgmr.msra.gmra.mxu0 %vm117_vm0, %v70_v7  ;;  %1352 = vmatmul.mubr.msk.bf16.vlgmr.msra.gmra.mxu1 %vm117_vm0, %v70_v7  ;;  %v1604_v17 = vld [vmem:[#allocation4 + $0x1fc] ss:$12 sps:$4 sm:$0xff]   ;;  %v1607_v20 = vld [vmem:[#allocation4 + $0x64] ss:$12 sps:$4 sm:$0xff]   ;;  %v1605_v22 = vld [vmem:[#allocation4 + $0x60] ss:$12 sps:$4 sm:$0xff]  }
  0x2f   :  { %877 = vmatpush1.bf16.msra.mxu0 %v1587_v8  ;;  %920 = vmatpush1.bf16.msra.mxu1 %v1590_v10  ;;  %v1610_v21 = vld [vmem:[#allocation4 + $0x1e4] ss:$12 sps:$4 sm:$0xff]   ;;  %v1608_v23 = vld [vmem:[#allocation4 + $0x1e0] ss:$12 sps:$4 sm:$0xff]   ;;  %v1611_v26 = vld [vmem:[#allocation4 + $0x48] ss:$12 sps:$4 sm:$0xff]   ;;  %v77_v10 = vlaneseq }
  0x30   :  { %878 = vmatprep.subr.bf16.mxu0 %v1595_v12  ;;  %921 = vmatprep.subr.bf16.mxu1 %v1598_v14  ;;  %v1613_v24 = vld [vmem:[#allocation4 + $0x4c] ss:$12 sps:$4 sm:$0xff]   ;;  %v1614_v27 = vld [vmem:[#allocation4 + $0x1c8] ss:$12 sps:$4 sm:$0xff]   ;;  %v1617_v30 = vld [vmem:[#allocation4 + $0x30] ss:$12 sps:$4 sm:$0xff]  }
  0x31   :  { %v1616_v25 = vld [vmem:[#allocation4 + $0x1cc] ss:$12 sps:$4 sm:$0xff]   ;;  %v1619_v28 = vld [vmem:[#allocation4 + $0x34] ss:$12 sps:$4 sm:$0xff]   ;;  %v1620_v31 = vld [vmem:[#allocation4 + $0x1b0] ss:$12 sps:$4 sm:$0xff]  }
  0x32   :  { %v1622_v29 = vld [vmem:[#allocation4 + $0x1b4] ss:$12 sps:$4 sm:$0xff]   ;;  %v1625_v32 = vld [vmem:[#allocation4 + $0x1c] ss:$12 sps:$4 sm:$0xff]   ;;  %v1623_v34 = vld [vmem:[#allocation4 + $0x18] ss:$12 sps:$4 sm:$0xff]  }
  0x33   :  { %879 = vmatpush1.bf16.msra.mxu0 %v1593_v13  ;;  %922 = vmatpush1.bf16.msra.mxu1 %v1596_v15  ;;  %v1628_v33 = vld [vmem:[#allocation4 + $0x19c] ss:$12 sps:$4 sm:$0xff]   ;;  %v1626_v35 = vld [vmem:[#allocation4 + $0x198] ss:$12 sps:$4 sm:$0xff]   ;;  %v1629_v38 = vld [vmem:[#allocation4] ss:$12 sps:$4 sm:$0xff]  }
  0x34   :  { %880 = vmatprep.subr.bf16.mxu0 %v1601_v16  ;;  %923 = vmatprep.subr.bf16.mxu1 %v1604_v17  ;;  %v1631_v36 = vld [vmem:[#allocation4 + $0x4] ss:$12 sps:$4 sm:$0xff]   ;;  %v1632_v39 = vld [vmem:[#allocation4 + $0x180] ss:$12 sps:$4 sm:$0xff]   ;;  %v1635_v42 = vld [vmem:[#allocation4 + $0x168] ss:$12 sps:$4 sm:$0xff]  }
  0x35   :  { %v1634_v37 = vld [vmem:[#allocation4 + $0x184] ss:$12 sps:$4 sm:$0xff]   ;;  %v1637_v40 = vld [vmem:[#allocation4 + $0x16c] ss:$12 sps:$4 sm:$0xff]   ;;  %v1638_v43 = vld [vmem:[#allocation4 + $0x2e8] ss:$12 sps:$4 sm:$0xff]  }
  0x36   :  { %v1640_v41 = vld [vmem:[#allocation4 + $0x2ec] ss:$12 sps:$4 sm:$0xff]   ;;  %v1643_v44 = vld [vmem:[#allocation4 + $0x154] ss:$12 sps:$4 sm:$0xff]   ;;  %v1641_v45 = vld [vmem:[#allocation4 + $0x150] ss:$12 sps:$4 sm:$0xff]  }
  0x37   :  { %881 = vmatpush1.bf16.msra.mxu0 %v1599_v18  ;;  %924 = vmatpush1.bf16.msra.mxu1 %v1602_v19  ;;  %v1646_v46 = vld [vmem:[#allocation4 + $0x2d4] ss:$12 sps:$4 sm:$0xff]   ;;  %v1644_v47 = vld [vmem:[#allocation4 + $0x2d0] ss:$12 sps:$4 sm:$0xff]   ;;  %v1647_v50 = vld [vmem:[#allocation4 + $0x138] ss:$12 sps:$4 sm:$0xff]  }
  0x38   :  { %882 = vmatprep.subr.bf16.mxu0 %v1607_v20  ;;  %925 = vmatprep.subr.bf16.mxu1 %v1610_v21  ;;  %v1649_v48 = vld [vmem:[#allocation4 + $0x13c] ss:$12 sps:$4 sm:$0xff]   ;;  %v1650_v51 = vld [vmem:[#allocation4 + $0x2b8] ss:$12 sps:$4 sm:$0xff]   ;;  %v1653_v54 = vld [vmem:[#allocation4 + $0x120] ss:$12 sps:$4 sm:$0xff]  }
  0x39   :  { %v1652_v49 = vld [vmem:[#allocation4 + $0x2bc] ss:$12 sps:$4 sm:$0xff]   ;;  %v1655_v52 = vld [vmem:[#allocation4 + $0x124] ss:$12 sps:$4 sm:$0xff]   ;;  %v1656_v55 = vld [vmem:[#allocation4 + $0x2a0] ss:$12 sps:$4 sm:$0xff]  }
  0x3a   :  { %v1658_v53 = vld [vmem:[#allocation4 + $0x2a4] ss:$12 sps:$4 sm:$0xff]   ;;  %v1661_v56 = vld [vmem:[#allocation4 + $0x10c] ss:$12 sps:$4 sm:$0xff]   ;;  %v1659_v58 = vld [vmem:[#allocation4 + $0x108] ss:$12 sps:$4 sm:$0xff]  }
  0x3b   :  { %883 = vmatpush1.bf16.msra.mxu0 %v1605_v22  ;;  %926 = vmatpush1.bf16.msra.mxu1 %v1608_v23  ;;  %v1664_v57 = vld [vmem:[#allocation4 + $0x28c] ss:$12 sps:$4 sm:$0xff]   ;;  %v1662_v59 = vld [vmem:[#allocation4 + $0x288] ss:$12 sps:$4 sm:$0xff]   ;;  %v1665_v62 = vld [vmem:[#allocation4 + $0xf0] ss:$12 sps:$4 sm:$0xff]  }
  0x3c   :  { %884 = vmatprep.subr.bf16.mxu0 %v1613_v24  ;;  %927 = vmatprep.subr.bf16.mxu1 %v1616_v25  ;;  %v1667_v60 = vld [vmem:[#allocation4 + $0xf4] ss:$12 sps:$4 sm:$0xff]   ;;  %v1668_v63 = vld [vmem:[#allocation4 + $0x270] ss:$12 sps:$4 sm:$0xff]   ;;  %v1671_v2 = vld [vmem:[#allocation4 + $0xd8] ss:$12 sps:$4 sm:$0xff]  }
  0x3d   :  { %v1670_v61 = vld [vmem:[#allocation4 + $0x274] ss:$12 sps:$4 sm:$0xff]   ;;  %v1673_v0 = vld [vmem:[#allocation4 + $0xdc] ss:$12 sps:$4 sm:$0xff]   ;;  %v1674_v3 = vld [vmem:[#allocation4 + $0x258] ss:$12 sps:$4 sm:$0xff]  }
  0x3e   :  { %v1676_v1 = vld [vmem:[#allocation4 + $0x25c] ss:$12 sps:$4 sm:$0xff]   ;;  %v1679_v4 = vld [vmem:[#allocation4 + $0xc4] ss:$12 sps:$4 sm:$0xff]   ;;  %v1677_v6 = vld [vmem:[#allocation4 + $0xc0] ss:$12 sps:$4 sm:$0xff]  }
  0x3f   :  { %885 = vmatpush1.bf16.msra.mxu0 %v1611_v26  ;;  %928 = vmatpush1.bf16.msra.mxu1 %v1614_v27  ;;  %v1682_v5 = vld [vmem:[#allocation4 + $0x244] ss:$12 sps:$4 sm:$0xff]   ;;  %v1680_v7 = vld [vmem:[#allocation4 + $0x240] ss:$12 sps:$4 sm:$0xff]   ;;  %v1874_v11 = vshrl.u32 %v77_v10, 7  ;;  %vm1818_vm1 = vmmov 0  }
  0x40   :  { %886 = vmatprep.subr.bf16.mxu0 %v1619_v28  ;;  %929 = vmatprep.subr.bf16.mxu1 %v1622_v29  ;;  %v1683_v8 = vld [vmem:[#allocation4 + $0x170] ss:$12 sps:$4 sm:$0xff]   ;;  %v75_v16 = vld [vmem:[%s1917_s2] sm:$0xf]  ;;  %vm1338_vm2 = vcmask 64512  }
  0x41   :  { %v1684_v9 = vld [vmem:[#allocation4 + $0x2f0] ss:$12 sps:$4 sm:$0xff]   ;;  %v83_v12 = vsub.s32 1, %v1874_v11  ;;  %v91_v13 = vsub.s32 3, %v1874_v11  ;;  %v79_v14 = vsub.s32 0, %v1874_v11  ;;  %v87_v15 = vsub.s32 2, %v1874_v11 }
  0x42   :  { %v1710_v10 = vld [vmem:[#allocation4 + $0x1a0] ss:$12 sps:$4 sm:$0xff]  }
  0x43   :  { %887 = vmatpush1.bf16.msra.mxu0 %v1617_v30  ;;  %930 = vmatpush1.bf16.msra.mxu1 %v1620_v31  ;;  %v84_v19 = vrot.slane %v75_v16, %v83_v12  ;;  %v92_v20 = vrot.slane %v75_v16, %v91_v13  ;;  %v80_v21 = vrot.slane %v75_v16, %v79_v14  ;;  %v1711_v13 = vld [vmem:[#allocation4 + $0xc8] ss:$12 sps:$4 sm:$0xff]  }
  0x44   :  { %888 = vmatprep.subr.bf16.mxu0 %v1625_v32  ;;  %931 = vmatprep.subr.bf16.mxu1 %v1628_v33  ;;  %v88_v22 = vrot.slane %v75_v16, %v87_v15  ;;  %v1712_v16 = vld [vmem:[#allocation4 + $0x248] ss:$12 sps:$4 sm:$0xff]  }
  0x47   :  { %889 = vmatpush1.bf16.msra.mxu0 %v1623_v34  ;;  %932 = vmatpush1.bf16.msra.mxu1 %v1626_v35 }
  0x48   :  { %890 = vmatprep.subr.bf16.mxu0 %v1631_v36  ;;  %933 = vmatprep.subr.bf16.mxu1 %v1634_v37 }
  0x4b   :  { %891 = vmatpush1.bf16.msra.mxu0 %v1629_v38  ;;  %934 = vmatpush1.bf16.msra.mxu1 %v1632_v39 }
  0x4c   :  { %892 = vmatprep.subr.bf16.mxu0 %v1637_v40  ;;  %935 = vmatprep.subr.bf16.mxu1 %v1640_v41 }
  0x4f   :  { %893 = vmatpush2.bf16.msra.mxu0 %v1635_v42  ;;  %936 = vmatpush2.bf16.msra.mxu1 %v1638_v43 }
  0x50   :  { %894 = vmatprep.subr.bf16.mxu0 %v1643_v44  ;;  %937 = vmatprep.subr.bf16.mxu1 %v1646_v46 }
  0x53   :  { %895 = vmatpush2.bf16.msra.mxu0 %v1641_v45  ;;  %938 = vmatpush2.bf16.msra.mxu1 %v1644_v47  ;;  %v1685_v47 = vld [vmem:[#allocation4 + $0xb0] ss:$12 sps:$4 sm:$0xff]  }
  0x54   :  { %896 = vmatprep.subr.bf16.mxu0 %v1649_v48  ;;  %939 = vmatprep.subr.bf16.mxu1 %v1652_v49  ;;  %v1686_v48 = vld [vmem:[#allocation4 + $0x230] ss:$12 sps:$4 sm:$0xff]  }
  0x57   :  { %897 = vmatpush2.bf16.msra.mxu0 %v1647_v50  ;;  %940 = vmatpush2.bf16.msra.mxu1 %v1650_v51  ;;  %v1687_v51 = vld [vmem:[#allocation4 + $0x158] ss:$12 sps:$4 sm:$0xff]  }
  0x58   :  { %898 = vmatprep.subr.bf16.mxu0 %v1655_v52  ;;  %941 = vmatprep.subr.bf16.mxu1 %v1658_v53  ;;  %v1688_v52 = vld [vmem:[#allocation4 + $0x2d8] ss:$12 sps:$4 sm:$0xff]  }
  0x59   :  { %v1689_v53 = vld [vmem:[#allocation4 + $0x98] ss:$12 sps:$4 sm:$0xff]  }
  0x5b   :  { %899 = vmatpush2.bf16.msra.mxu0 %v1653_v54  ;;  %942 = vmatpush2.bf16.msra.mxu1 %v1656_v55  ;;  %v1690_v54 = vld [vmem:[#allocation4 + $0x218] ss:$12 sps:$4 sm:$0xff]   ;;  %v1691_v55 = vld [vmem:[#allocation4 + $0x140] ss:$12 sps:$4 sm:$0xff]  }
  0x5c   :  { %900 = vmatprep.subr.bf16.mxu0 %v1661_v56  ;;  %943 = vmatprep.subr.bf16.mxu1 %v1664_v57  ;;  %v1692_v56 = vld [vmem:[#allocation4 + $0x2c0] ss:$12 sps:$4 sm:$0xff]  }
  0x5d   :  { %v1693_v57 = vld [vmem:[#allocation4 + $0x80] ss:$12 sps:$4 sm:$0xff]  }
  0x5f   :  { %901 = vmatpush2.bf16.msra.mxu0 %v1659_v58  ;;  %944 = vmatpush2.bf16.msra.mxu1 %v1662_v59  ;;  %v1694_v58 = vld [vmem:[#allocation4 + $0x200] ss:$12 sps:$4 sm:$0xff]   ;;  %v1695_v59 = vld [vmem:[#allocation4 + $0x128] ss:$12 sps:$4 sm:$0xff]  }
  0x60   :  { %902 = vmatprep.subr.bf16.mxu0 %v1667_v60  ;;  %945 = vmatprep.subr.bf16.mxu1 %v1670_v61  ;;  %v1696_v60 = vld [vmem:[#allocation4 + $0x2a8] ss:$12 sps:$4 sm:$0xff]  }
  0x61   :  { %v1697_v61 = vld [vmem:[#allocation4 + $0x68] ss:$12 sps:$4 sm:$0xff]  }
  0x63   :  { %903 = vmatpush2.bf16.msra.mxu0 %v1665_v62  ;;  %946 = vmatpush2.bf16.msra.mxu1 %v1668_v63  ;;  %v1698_v62 = vld [vmem:[#allocation4 + $0x1e8] ss:$12 sps:$4 sm:$0xff]   ;;  %v1699_v63 = vld [vmem:[#allocation4 + $0x110] ss:$12 sps:$4 sm:$0xff]  }
  0x64   :  { %904 = vmatprep.subr.bf16.mxu0 %v1673_v0  ;;  %947 = vmatprep.subr.bf16.mxu1 %v1676_v1  ;;  %v1700_v0 = vld [vmem:[#allocation4 + $0x290] ss:$12 sps:$4 sm:$0xff]  }
  0x65   :  { %v1701_v1 = vld [vmem:[#allocation4 + $0x50] ss:$12 sps:$4 sm:$0xff]  }
  0x67   :  { %905 = vmatpush2.bf16.msra.mxu0 %v1671_v2  ;;  %948 = vmatpush2.bf16.msra.mxu1 %v1674_v3  ;;  %v1702_v2 = vld [vmem:[#allocation4 + $0x1d0] ss:$12 sps:$4 sm:$0xff]   ;;  %v1703_v3 = vld [vmem:[#allocation4 + $0xf8] ss:$12 sps:$4 sm:$0xff]  }
  0x68   :  { %906 = vmatprep.subr.bf16.mxu0 %v1679_v4  ;;  %949 = vmatprep.subr.bf16.mxu1 %v1682_v5  ;;  %v1704_v4 = vld [vmem:[#allocation4 + $0x278] ss:$12 sps:$4 sm:$0xff]  }
  0x69   :  { %v1705_v5 = vld [vmem:[#allocation4 + $0x38] ss:$12 sps:$4 sm:$0xff]  }
  0x6b   :  { %907 = vmatpush2.bf16.msra.mxu0 %v1677_v6  ;;  %950 = vmatpush2.bf16.msra.mxu1 %v1680_v7  ;;  %v1706_v6 = vld [vmem:[#allocation4 + $0x1b8] ss:$12 sps:$4 sm:$0xff]   ;;  %v1707_v7 = vld [vmem:[#allocation4 + $0xe0] ss:$12 sps:$4 sm:$0xff]  }
  0x6c   :  { %1474 = vmatprep.subr.bf16.mxu0 %v1683_v8  ;;  %1496 = vmatprep.subr.bf16.mxu1 %v1684_v9  ;;  %v1708_v8 = vld [vmem:[#allocation4 + $0x260] ss:$12 sps:$4 sm:$0xff]  }
  0x6d   :  { %v1709_v9 = vld [vmem:[#allocation4 + $0x20] ss:$12 sps:$4 sm:$0xff]  }
  0xee   :  { %v155_v17 = vpop.f32.mrf.mxu0  ;;  %v198_v18 = vpop.f32.mrf.mxu1 }
  0xef   :  { %v156_v31 = vadd.f32 %v155_v17, %v80_v21  ;;  %v199_v32 = vadd.f32 %v198_v18, %v88_v22  ;;  %v1713_v17 = vld [vmem:[#allocation4 + $0x8] ss:$12 sps:$4 sm:$0xff]  }
  0xf0   :  { %v157_v23 = vpop.f32.mrf.mxu0  ;;  %v200_v24 = vpop.f32.mrf.mxu1  ;;  %v1714_v18 = vld [vmem:[#allocation4 + $0x188] ss:$12 sps:$4 sm:$0xff]  }
  0xf1   :  { %v158_v27 = vadd.f32 %v157_v23, %v84_v19  ;;  %v201_v28 = vadd.f32 %v200_v24, %v92_v20  ;;  %v207_v43 = vmax.f32 %v156_v31, 0.0  ;;  %v209_v44 = vmax.f32 %v199_v32, 0.0  ;;  %v1719_v23 = vld [vmem:[#allocation6 + $0x68] sm:$0xff]  }
  0xf2   :  { %v159_v25 = vpop.f32.mrf.mxu0  ;;  %v202_v26 = vpop.f32.mrf.mxu1  ;;  %v1720_v24 = vld [vmem:[#allocation6 + $0x28] sm:$0xff]  }
  0xf3   :  { %v160_v29 = vadd.f32 %v159_v25, %v80_v21  ;;  %v203_v30 = vadd.f32 %v202_v26, %v88_v22  ;;  %v208_v39 = vmax.f32 %v158_v27, 0.0  ;;  %v210_v40 = vmax.f32 %v201_v28, 0.0  ;;  %v1717_v21 = vld [vmem:[#allocation6 + $0x70] sm:$0xff]   ;;  %v1721_v25 = vld [vmem:[#allocation6 + $0x60] sm:$0xff]   ;;  %v1723_v27 = vld [vmem:[#allocation6 + $0x58] sm:$0xff]  }
  0xf4   :  { %v161_v33 = vpop.f32.mrf.mxu0  ;;  %v204_v34 = vpop.f32.mrf.mxu1  ;;  %v1718_v22 = vld [vmem:[#allocation6 + $0x30] sm:$0xff]   ;;  %v1722_v26 = vld [vmem:[#allocation6 + $0x20] sm:$0xff]   ;;  %v1724_v28 = vld [vmem:[#allocation6 + $0x18] sm:$0xff]  }
  0xf5   :  { %v162_v35 = vadd.f32 %v161_v33, %v84_v19  ;;  %v205_v36 = vadd.f32 %v204_v34, %v92_v20  ;;  %v211_v37 = vmax.f32 %v160_v29, 0.0  ;;  %v213_v38 = vmax.f32 %v203_v30, 0.0  ;;  %v1715_v19 = vld [vmem:[#allocation6 + $0x78] sm:$0xff]   ;;  %v1725_v29 = vld [vmem:[#allocation6 + $0x50] sm:$0xff]   ;;  %v1727_v31 = vld [vmem:[#allocation6 + $0x48] sm:$0xff]  }
  0xf6   :  { %v1716_v20 = vld [vmem:[#allocation6 + $0x38] sm:$0xff]   ;;  %v1726_v30 = vld [vmem:[#allocation6 + $0x10] sm:$0xff]   ;;  %v1728_v32 = vld [vmem:[#allocation6 + $0x8] sm:$0xff]  }
  0xf7   :  { %v212_v41 = vmax.f32 %v162_v35, 0.0  ;;  %v214_v42 = vmax.f32 %v205_v36, 0.0  ;;  %v1889_v49 = vpack.c.bf16 %v211_v37, %v207_v43  ;;  %v1891_v50 = vpack.c.bf16 %v213_v38, %v209_v44  ;;  %v1729_v33 = vld [vmem:[#allocation6 + $0x40] sm:$0xff]   ;;  %v1731_v35 = vld [vmem:[#allocation6 + $0xb8] sm:$0xff]   ;;  %v1732_v37 = vld [vmem:[#allocation6 + $0xb0] sm:$0xff]  }
  0xf8   :  { %v1730_v34 = vld [vmem:[#allocation6] sm:$0xff]   ;;  %v1817_v36 = vmov 0.0   ;;  %v1733_v38 = vld [vmem:[#allocation6 + $0xa8] sm:$0xff]  }
  0xf9   :  { %v216_v45 = vpack.c.bf16 %v212_v41, %v208_v39  ;;  %v218_v46 = vpack.c.bf16 %v214_v42, %v210_v40  ;;  %v1734_v39 = vld [vmem:[#allocation6 + $0xa0] sm:$0xff]   ;;  %v1735_v40 = vld [vmem:[#allocation6 + $0x98] sm:$0xff]   ;;  %v1736_v41 = vld [vmem:[#allocation6 + $0x90] sm:$0xff]  }
  0xfa   :  { %v1737_v42 = vld [vmem:[#allocation6 + $0x88] sm:$0xff]   ;;  %v1738_v43 = vld [vmem:[#allocation6 + $0x80] sm:$0xff]  }
  0xfb   :  { %908 = vmatprep.mubr.bf16.mxu0 %v216_v45  ;;  %951 = vmatprep.mubr.bf16.mxu1 %v218_v46  ;;  %v347_v44 = vld [vmem:[%s1919_s4] sm:$0x7] }
  0xfc   :  { %909 = vmatmul.mubr.bf16.vlgmr.msra.gmra.mxu0 %v1889_v49  ;;  %952 = vmatmul.mubr.bf16.vlgmr.msra.gmra.mxu1 %v1891_v50 }
  0xfd   :  { %1475 = vmatpush3.bf16.msra.mxu0 %v1685_v47  ;;  %1497 = vmatpush3.bf16.msra.mxu1 %v1686_v48 }
  0xfe   :  { %994 = vmatprep.mubr.bf16.mxu0 %v216_v45  ;;  %1035 = vmatprep.mubr.bf16.mxu1 %v218_v46  ;;  %v356_v45 = vrot.slane %v347_v44, %v83_v12  ;;  %v352_v46 = vrot.slane %v347_v44, %v79_v14 }
  0xff   :  { %1476 = vmatprep.subr.bf16.mxu0 %v1687_v51  ;;  %1498 = vmatprep.subr.bf16.mxu1 %v1688_v52 }
 0x101   :  { %1477 = vmatpush3.bf16.msra.mxu0 %v1689_v53  ;;  %1499 = vmatpush3.bf16.msra.mxu1 %v1690_v54 }
 0x102   :  { %1478 = vmatprep.subr.bf16.mxu0 %v1691_v55  ;;  %1500 = vmatprep.subr.bf16.mxu1 %v1692_v56 }
 0x105   :  { %1479 = vmatpush3.bf16.msra.mxu0 %v1693_v57  ;;  %1501 = vmatpush3.bf16.msra.mxu1 %v1694_v58 }
 0x106   :  { %1480 = vmatprep.subr.bf16.mxu0 %v1695_v59  ;;  %1502 = vmatprep.subr.bf16.mxu1 %v1696_v60 }
 0x109   :  { %1481 = vmatpush3.bf16.msra.mxu0 %v1697_v61  ;;  %1503 = vmatpush3.bf16.msra.mxu1 %v1698_v62 }
 0x10a   :  { %1482 = vmatprep.subr.bf16.mxu0 %v1699_v63  ;;  %1504 = vmatprep.subr.bf16.mxu1 %v1700_v0 }
 0x10d   :  { %1483 = vmatpush3.bf16.msra.mxu0 %v1701_v1  ;;  %1505 = vmatpush3.bf16.msra.mxu1 %v1702_v2 }
 0x10e   :  { %1484 = vmatprep.subr.bf16.mxu0 %v1703_v3  ;;  %1506 = vmatprep.subr.bf16.mxu1 %v1704_v4 }
 0x111   :  { %1485 = vmatpush3.bf16.msra.mxu0 %v1705_v5  ;;  %1507 = vmatpush3.bf16.msra.mxu1 %v1706_v6  ;;  %v360_v5 = vrot.slane %v347_v44, %v87_v15 }
 0x112   :  { %1486 = vmatprep.subr.bf16.mxu0 %v1707_v7  ;;  %1508 = vmatprep.subr.bf16.mxu1 %v1708_v8 }
 0x115   :  { %1487 = vmatpush3.bf16.msra.mxu0 %v1709_v9  ;;  %1509 = vmatpush3.bf16.msra.mxu1 %v1710_v10 }
 0x116   :  { %1488 = vmatprep.subr.bf16.mxu0 %v1711_v13  ;;  %1510 = vmatprep.subr.bf16.mxu1 %v1712_v16 }
 0x119   :  { %1489 = vmatpush3.bf16.msra.mxu0 %v1713_v17  ;;  %1511 = vmatpush3.bf16.msra.mxu1 %v1714_v18 }
 0x11a   :  { %1518 = vmatprep.subr.bf16.mxu0 %v1715_v19  ;;  %1549 = vmatprep.subr.bf16.mxu1 %v1817_v36 }
 0x11c   :  { %995 = vmatmul.mubr.bf16.vlgmr.msra.gmra.mxu0 %v1889_v49  ;;  %1036 = vmatmul.mubr.bf16.vlgmr.msra.gmra.mxu1 %v1891_v50 }
 0x11d   :  { %1519 = vmatpush3.bf16.msra.mxu0 %v1716_v20  ;;  %1550 = vmatpush3.bf16.msra.mxu1 %v1731_v35 }
 0x11e   :  { %1520 = vmatprep.subr.bf16.mxu0 %v1717_v21  ;;  %1551 = vmatprep.subr.bf16.mxu1 %v1817_v36 }
 0x11f   :  { %1565 = vmatprep.mubr.msk.bf16.mxu1 %vm1818_vm1, %v1817_v36 }
 0x121   :  { %1521 = vmatpush3.bf16.msra.mxu0 %v1718_v22  ;;  %1552 = vmatpush3.bf16.msra.mxu1 %v1732_v37 }
 0x122   :  { %1522 = vmatprep.subr.bf16.mxu0 %v1719_v23  ;;  %1553 = vmatprep.subr.bf16.mxu1 %v1817_v36 }
 0x125   :  { %1523 = vmatpush3.bf16.msra.mxu0 %v1720_v24  ;;  %1554 = vmatpush3.bf16.msra.mxu1 %v1733_v38 }
 0x126   :  { %1524 = vmatprep.subr.bf16.mxu0 %v1721_v25  ;;  %1555 = vmatprep.subr.bf16.mxu1 %v1817_v36 }
 0x129   :  { %1525 = vmatpush3.bf16.msra.mxu0 %v1722_v26  ;;  %1556 = vmatpush3.bf16.msra.mxu1 %v1734_v39 }
 0x12a   :  { %1526 = vmatprep.subr.bf16.mxu0 %v1723_v27  ;;  %1557 = vmatprep.subr.bf16.mxu1 %v1817_v36 }
 0x12d   :  { %1527 = vmatpush3.bf16.msra.mxu0 %v1724_v28  ;;  %1558 = vmatpush3.bf16.msra.mxu1 %v1735_v40 }
 0x12e   :  { %1528 = vmatprep.subr.bf16.mxu0 %v1725_v29  ;;  %1559 = vmatprep.subr.bf16.mxu1 %v1817_v36 }
 0x131   :  { %1529 = vmatpush3.bf16.msra.mxu0 %v1726_v30  ;;  %1560 = vmatpush3.bf16.msra.mxu1 %v1736_v41 }
 0x132   :  { %1530 = vmatprep.subr.bf16.mxu0 %v1727_v31  ;;  %1561 = vmatprep.subr.bf16.mxu1 %v1817_v36  ;;  %v1473_v31 = vld [vmem:[%s1921_s6] ss:$0 sm:$0xff] }
 0x135   :  { %1531 = vmatpush3.bf16.msra.mxu0 %v1728_v32  ;;  %1562 = vmatpush3.bf16.msra.mxu1 %v1737_v42 }
 0x136   :  { %1532 = vmatprep.subr.bf16.mxu0 %v1729_v33  ;;  %1563 = vmatprep.subr.bf16.mxu1 %v1817_v36 }
 0x139   :  { %1533 = vmatpush3.bf16.msra.mxu0 %v1730_v34  ;;  %1564 = vmatpush3.bf16.msra.mxu1 %v1738_v43 }
 0x1bc   :  { %v910_v47 = vpop.f32.mrf.mxu0  ;;  %v953_v48 = vpop.f32.mrf.mxu1 }
 0x1bd   :  { %v911_v52 = vadd.f32 %v910_v47, %v352_v46 }
 0x1be   :  { %v912_v49 = vpop.f32.mrf.mxu0  ;;  %v955_v50 = vpop.f32.mrf.mxu1 }
 0x1bf   :  { %v913_v51 = vadd.f32 %v912_v49, %v356_v45  ;;  %v954_v60 = vadd.f32 %v953_v48, %v911_v52 }
 0x1c0   :  { %v914_v53 = vpop.f32.mrf.mxu0  ;;  %v957_v54 = vpop.f32.mrf.mxu1 }
 0x1c1   :  { %v915_v55 = vadd.f32 %v914_v53, %v352_v46  ;;  %v956_v57 = vadd.f32 %v955_v50, %v913_v51  ;;  %v1044_v14 = vmax.f32 %v954_v60, 0.0 }
 0x1c2   :  { %v916_v56 = vpop.f32.mrf.mxu0  ;;  %v959_v61 = vpop.f32.mrf.mxu1 }
 0x1c3   :  { %v958_v58 = vadd.f32 %v957_v54, %v915_v55  ;;  %v917_v59 = vadd.f32 %v916_v56, %v356_v45  ;;  %v1045_v63 = vmax.f32 %v956_v57, 0.0 }
 0x1c5   :  { %v960_v62 = vadd.f32 %v959_v61, %v917_v59  ;;  %v1047_v12 = vmax.f32 %v958_v58, 0.0 }
 0x1c7   :  { %v1048_v0 = vmax.f32 %v960_v62, 0.0  ;;  %v1050_v2 = vpack.c.bf16 %v1047_v12, %v1044_v14 }
 0x1c9   :  { %v1051_v1 = vpack.c.bf16 %v1048_v0, %v1045_v63 }
 0x1cb   :  { %1277 = vmatprep.mubr.bf16.mxu0 %v1051_v1 }
 0x1cc   :  { %1278 = vmatmul.mubr.bf16.vlgmr.msra.gmra.mxu0 %v1050_v2 }
 0x1dc   :  { %v1490_v3 = vpop.f32.mrf.mxu0  ;;  %v1512_v4 = vpop.f32.mrf.mxu1 }
 0x1de   :  { %v1491_v6 = vpop.f32.mrf.mxu0  ;;  %v1513_v7 = vpop.f32.mrf.mxu1 }
 0x1df   :  { %v1492_v8 = vadd.f32 %v1491_v6, %v1490_v3  ;;  %v1514_v18 = vadd.f32 %v1513_v7, %v1512_v4 }
 0x1e0   :  { %v1493_v9 = vpop.f32.mrf.mxu0  ;;  %v1515_v10 = vpop.f32.mrf.mxu1 }
 0x1e1   :  { %v997_v13 = vadd.f32 %v1492_v8, %v360_v5 }
 0x1e2   :  { %v1494_v16 = vpop.f32.mrf.mxu0  ;;  %v1516_v17 = vpop.f32.mrf.mxu1 }
 0x1e3   :  { %v1495_v19 = vadd.f32 %v1494_v16, %v1493_v9  ;;  %v1038_v20 = vadd.f32 %v1514_v18, %v997_v13  ;;  %v1517_v22 = vadd.f32 %v1516_v17, %v1515_v10 }
 0x1e5   :  { %v1000_v21 = vadd.f32 %v1495_v19, %v360_v5  ;;  %v1046_v24 = vmax.f32 %v1038_v20, 0.0 }
 0x1e7   :  { %v1041_v23 = vadd.f32 %v1517_v22, %v1000_v21 }
 0x1e9   :  { %v1049_v25 = vmax.f32 %v1041_v23, 0.0 }
 0x1eb   :  { %v1052_v26 = vpack.c.bf16 %v1049_v25, %v1046_v24 }
 0x1ed   :  { %1566 = vmatmul.mubr.bf16.vlgmr.msra.gmra.mxu1 %v1052_v26 }
 0x28c   :  { %v1534_v11 = vpop.f32.mrf.mxu0 }
 0x28e   :  { %v1535_v15 = vpop.f32.mrf.mxu0 }
 0x28f   :  { %v1536_v28 = vadd.f32 %v1535_v15, %v1534_v11 }
 0x290   :  { %v1537_v27 = vpop.f32.mrf.mxu0 }
 0x292   :  { %v1538_v29 = vpop.f32.mrf.mxu0 }
 0x293   :  { %v1539_v34 = vadd.f32 %v1538_v29, %v1537_v27 }
 0x2ad   :  { %v1320_v30 = vpop.f32.mrf.mxu1 }
 0x2ae   :  { %v1321_v32 = vadd.f32 %v1536_v28, %v1320_v30 }
 0x2af   :  { %v1567_v33 = vpop.f32.mrf.mxu1 }
 0x2b0   :  { %v1334_v35 = vadd.f32 %v1473_v31, %v1321_v32 }
 0x2b1   :  { %v1323_v36 = vpop.f32.mrf.mxu1 }
 0x2b2   :  { %1739 = vtanh.f32 %v1334_v35  ;;  %v1324_v37 = vadd.f32 %v1539_v34, %v1323_v36 }
 0x2b3   :  { %v1568_v38 = vpop.f32.mrf.mxu1 }
 0x2b4   :  { %v1335_v39 = vadd.f32 %v1473_v31, %v1324_v37 }
 0x2b6   :  { %1741 = vtanh.f32 %v1335_v39 }
 0x2bf   :  { %v1740_v40 = vpop.eup %1739 }
 0x2c0   :  { %1339 = vst.msk [vmem:[%s1922_s7] sm:$0xff] %vm1338_vm2, %v1740_v40 }
 0x2c3   :  { %v1742_v41 = vpop.eup %1741 }
 0x2c4   :  { %1340 = vst.msk [vmem:[%s1922_s7 + $0x8] sm:$0xff] %vm1338_vm2, %v1742_v41 }
 0x2c5   :  { %1345 = vsyncpa [#allocation3], 1 }
 0x2c6   :  { %1346 = vsyncpa [#allocation5], 1 }

</bundles_post_ra>
